<compile_context>
chip_gen: v6e
topology: v6e:2x2x1
jax: 0.10.0
libtpu: 0.0.40
codegen_flags: <defaults>
</compile_context>

<pallas_src>
import functools

import jax
import jax.numpy as jnp
from jax.experimental import pallas as pl
from jax.experimental.pallas import tpu as pltpu


def _round_up(x, m):
    return ((x + m - 1) // m) * m


# Target bytes per streamed E block (review: ~2-8 MiB recovers HBM roofline).
_TILE_TARGET_BYTES = 4 << 20


def _pick_tile(seq_len, feat, itemsize, target_bytes=_TILE_TARGET_BYTES):
    """Byte-budget tile choice.  Returns (tile_s, s_pad) with tile_s | s_pad."""
    s_ru = _round_up(max(seq_len, 1), 128)
    bytes_per_pos = feat * itemsize             # one sequence position = one lane column
    if s_ru * bytes_per_pos <= target_bytes:    # whole (padded) E fits -> single grid step
        return s_ru, s_ru
    tile_s = _round_up(max(target_bytes // bytes_per_pos, 128), 128)
    tile_s = min(tile_s, s_ru)
    s_pad = _round_up(seq_len, tile_s)
    return tile_s, s_pad


# -----------------------------------------------------------------------------
# Fused kernel: streamed logits (v @ E^T) + online, masked, stable softmax.
#   v_ref   : (B, F)        compute dtype (bf16/f32) -- per-query score vector
#   e_ref   : (F, tile_s)   compute dtype            -- streamed E^T tile (lanes = seq)
#   out_ref : (B, S_pad)    f32, resident across the sequence grid
#   m_ref   : (B, 1)        f32 scratch, running row max
#   l_ref   : (B, 1)        f32 scratch, running row sum-of-exp
# -----------------------------------------------------------------------------
def _scores_softmax_kernel(v_ref, e_ref, out_ref, m_ref, l_ref, *,
                           seq_len, tile_s, num_tiles, padded):
    i = pl.program_id(0)
    start = pl.multiple_of(i * tile_s, tile_s)

    # (B, tile_s) logit block on the MXU, f32 accumulation; sequence on lanes.
    scores = jnp.dot(v_ref[...], e_ref[...], preferred_element_type=jnp.float32)

    if padded:  # kill lanes past the real sequence (only the last tile has them)
        lane = jax.lax.broadcasted_iota(jnp.int32, scores.shape, 1) + start
        scores = jnp.where(lane < seq_len, scores, -jnp.inf)

    if num_tiles == 1:
        # Whole (padded) row already in registers: direct one-pass stable softmax.
        m = jnp.max(scores, axis=-1, keepdims=True)
        e = jnp.exp(scores - m)
        l = jnp.sum(e, axis=-1, keepdims=True)
        r = pl.reciprocal(l, approx=True)            # EUP slot
        r = r * (2.0 - l * r)                        # one Newton step -> ~f32 exact
        out_ref[...] = e * r
        return

    @pl.when(i == 0)
    def _init():
        m_ref[...] = jnp.full_like(m_ref, -jnp.inf)
        l_ref[...] = jnp.zeros_like(l_ref)

    # Online softmax statistics (this work hides under the next tile's DMA).
    m_prev = m_ref[...]
    m_new = jnp.maximum(m_prev, jnp.max(scores, axis=-1, keepdims=True))
    l_ref[...] = (l_ref[...] * jnp.exp(m_prev - m_new)
                  + jnp.sum(jnp.exp(scores - m_new), axis=-1, keepdims=True))
    m_ref[...] = m_new

    # Lane-dense, unmasked store of the raw (shift-pending) logits.
    out_ref[:, pl.ds(start, tile_s)] = scores

    # Last grid step: single chunked exp+rescale pass over the resident row.
    @pl.when(i == num_tiles - 1)
    def _finalize():
        m = m_ref[...]
        l = l_ref[...]
        r = pl.reciprocal(l, approx=True)
        r = r * (2.0 - l * r)

        def body(t, carry):
            off = pl.multiple_of(t * tile_s, tile_s)
            blk = out_ref[:, pl.ds(off, tile_s)]
            out_ref[:, pl.ds(off, tile_s)] = jnp.exp(blk - m) * r
            return carry

        jax.lax.fori_loop(0, num_tiles, body, 0)


def _attn_scores_softmax(v, e_t, seq_len, tile_s, s_pad):
    B, F = v.shape
    num_tiles = s_pad // tile_s
    itemsize = jnp.dtype(v.dtype).itemsize
    tile_e_bytes = tile_s * F * itemsize

    # Explicit VMEM budget: double-buffered E tile + resident score row +
    # finalize temporaries + v.  Clamped to 64 MiB (v7x physical) and floored
    # at 16 MiB so large-F tiles are never starved by v5e's default scoped limit.
    est = (2 * tile_e_bytes
           + 2 * B * s_pad * 4
           + 6 * B * tile_s * 4
           + 2 * B * F * itemsize
           + (2 << 20))
    vmem_limit = int(min(max(est, 16 << 20), 64 << 20))

    kernel = functools.partial(_scores_softmax_kernel, seq_len=seq_len,
                               tile_s=tile_s, num_tiles=num_tiles,
                               padded=(s_pad != seq_len))
    return pl.pallas_call(
        kernel,
        out_shape=jax.ShapeDtypeStruct((B, s_pad), jnp.float32),
        grid_spec=pltpu.PrefetchScalarGridSpec(
            num_scalar_prefetch=0,
            grid=(num_tiles,),
            in_specs=[
                pl.BlockSpec((B, F), lambda i: (0, 0)),        # v: revisited
                pl.BlockSpec((F, tile_s), lambda i: (0, i)),   # E^T: streamed over S
            ],
            out_specs=pl.BlockSpec((B, s_pad), lambda i: (0, 0)),  # resident score row
            scratch_shapes=[pltpu.VMEM((B, 1), jnp.float32),   # running max
                            pltpu.VMEM((B, 1), jnp.float32)],  # running sum-of-exp
        ),
        compiler_params=pltpu.CompilerParams(
            dimension_semantics=("arbitrary",),
            vmem_limit_bytes=vmem_limit),
    )(v, e_t)


# -----------------------------------------------------------------------------
# Module-equivalent wrapper with deterministic parameter init.
# -----------------------------------------------------------------------------
class AttnPallas:
    def __init__(self, method, feature_size_1, feature_size_2, hidden_size, key,
                 compute_dtype=jnp.bfloat16, tile_target_bytes=_TILE_TARGET_BYTES):
        if method not in ('dot', 'general', 'concat'):
            raise ValueError(method)
        self.method = method
        self.feature_size_1 = feature_size_1
        self.feature_size_2 = feature_size_2
        self.hidden_size = hidden_size
        self.compute_dtype = compute_dtype
        self.tile_target_bytes = tile_target_bytes

        k_w, k_b, k_p = jax.random.split(key, 3)
        if method == 'general':
            in_f = hidden_size
            bound = 1.0 / float(in_f) ** 0.5
            self.W = jax.random.uniform(k_w, (hidden_size, in_f), jnp.float32, -bound, bound)
            self.b = jax.random.uniform(k_b, (1, hidden_size), jnp.float32, -bound, bound)
        elif method == 'concat':
            in_f = feature_size_1 + feature_size_2
            bound = 1.0 / float(in_f) ** 0.5
            self.W = jax.random.uniform(k_w, (hidden_size, in_f), jnp.float32, -bound, bound)
            self.b = jax.random.uniform(k_b, (1, hidden_size), jnp.float32, -bound, bound)
            self.param = jax.random.uniform(k_p, (1, hidden_size), jnp.float32, -1.0, 1.0)
            # Fold once: score_i = (p @ W2) . e_i ; the h-dependent and bias
            # terms are row-constant -> exactly dropped under softmax.
            W2 = self.W[:, feature_size_1:]                 # (H, F2)
            self.q = self.param @ W2                        # (1, F2)

        self._jit_forward = jax.jit(self._forward)

    # jitted forward: tiny folding math fuses around the single fused kernel.
    def _forward(self, h2d, enc):
        h2d = h2d.astype(jnp.float32)
        enc = enc.astype(jnp.float32)
        B = h2d.shape[0]
        S, F = enc.shape
        cd = self.compute_dtype

        # Every scoring method is one streamed mat-vec against E (row-constant
        # offsets removed: softmax is shift-invariant per row).
        if self.method == 'dot':
            v = h2d                                             # (B, F)
        elif self.method == 'general':
            v = h2d @ self.W                                    # (B, H) == (W^T h)^T
        else:  # 'concat'
            v = jnp.broadcast_to(self.q, (B, self.q.shape[1]))  # (B, F2)

        tile_s, s_pad = _pick_tile(S, F, jnp.dtype(cd).itemsize,
                                   self.tile_target_bytes)
        # Fused pad + transpose + cast: lane-dense (F, S_pad) in compute dtype.
        e_t = jnp.pad(enc, ((0, s_pad - S), (0, 0))).T.astype(cd)

        out = _attn_scores_softmax(v.astype(cd), e_t, S, tile_s, s_pad)
        return out[:, :S]

    def __call__(self, hidden, encoder_outputs):
        # hidden: (F,) -> output (1, S) exactly like the PyTorch module,
        # or (B, F) -> output (B, S) (batched queries amortize the E stream).
        h2d = hidden.reshape(1, -1) if hidden.ndim == 1 else hidden
        return self._jit_forward(h2d, encoder_outputs)


# -----------------------------------------------------------------------------
# Pure-JAX references (mirror the PyTorch forward exactly, offsets included).
# -----------------------------------------------------------------------------
def _softmax_rows(x):
    m = jnp.max(x, axis=-1, keepdims=True)
    e = jnp.exp(x - m)
    return e / jnp.sum(e, axis=-1, keepdims=True)


def ref_dot(h2d, E):
    return _softmax_rows(h2d @ E.T)


def ref_general(h2d, E, W, b):
    proj = E @ W.T + b.reshape(-1)           # Linear(encoder_output_i)
    return _softmax_rows(h2d @ proj.T)       # hidden . energy_i


def ref_concat(h2d, E, W, b, p):
    S = E.shape[0]
    rows = []
    for i in range(h2d.shape[0]):
        h_tiled = jnp.tile(h2d[i][None, :], (S, 1))
        cat = jnp.concatenate([h_tiled, E], axis=1)
        energy = cat @ W.T + b.reshape(-1)   # (S, H)
        rows.append(energy @ p.reshape(-1))  # parameter @ energy^T
    return _softmax_rows(jnp.stack(rows, 0))


# -----------------------------------------------------------------------------
if __name__ == "__main__":
    key = jax.random.PRNGKey(0)
    k_h, k_e, k_hb, k_el, k_m1, k_m2, k_m3 = jax.random.split(key, 7)

    S, H = 8, 32        # seq_len, hidden_size (== feature size for dot/general)
    F1, F2 = 16, 32     # concat: hidden is (F1,), encoder outputs are (S, F2)

    hidden = jax.random.normal(k_h, (H,), jnp.float32)
    enc = jax.random.normal(k_e, (S, H), jnp.float32)

    ok = True

    # ---- f32 compute path: matches the PyTorch-equivalent references tightly ----
    attn_dot = AttnPallas('dot', F1, F2, H, k_m1, compute_dtype=jnp.float32)
    out_dot = jax.block_until_ready(attn_dot(hidden, enc))
    ok &= bool(jnp.allclose(out_dot, ref_dot(hidden[None, :], enc), atol=1e-4, rtol=1e-4))

    attn_gen = AttnPallas('general', F1, F2, H, k_m2, compute_dtype=jnp.float32)
    out_gen = jax.block_until_ready(attn_gen(hidden, enc))
    ok &= bool(jnp.allclose(out_gen, ref_general(hidden[None, :], enc, attn_gen.W, attn_gen.b),
                            atol=1e-4, rtol=1e-4))

    hidden_c = jax.random.normal(k_h, (F1,), jnp.float32)
    enc_c = jax.random.normal(k_e, (S, F2), jnp.float32)
    attn_cat = AttnPallas('concat', F1, F2, H, k_m3, compute_dtype=jnp.float32)
    out_cat = jax.block_until_ready(attn_cat(hidden_c, enc_c))
    ok &= bool(jnp.allclose(out_cat, ref_concat(hidden_c[None, :], enc_c, attn_cat.W,
                                                attn_cat.b, attn_cat.param),
                            atol=1e-4, rtol=1e-4))
    assert out_dot.shape == (1, S) and out_gen.shape == (1, S) and out_cat.shape == (1, S)

    # ---- batched queries (B=8) on the default bf16 compute path ----
    B = 8
    hidden_b = jax.random.normal(k_hb, (B, H), jnp.float32)
    attn_gen_bf16 = AttnPallas('general', F1, F2, H, k_m2)     # bf16 MXU inputs
    out_b = jax.block_until_ready(attn_gen_bf16(hidden_b, enc))
    ok &= bool(jnp.allclose(out_b, ref_general(hidden_b, enc, attn_gen_bf16.W, attn_gen_bf16.b),
                            atol=5e-2, rtol=5e-2))
    assert out_b.shape == (B, S)

    # ---- longer, non-128-aligned sequence: single-tile path + padded-lane masking ----
    S_long = 300
    enc_long = jax.random.normal(k_el, (S_long, H), jnp.float32)
    out_long = jax.block_until_ready(attn_dot(hidden, enc_long))
    ok &= bool(jnp.allclose(out_long, ref_dot(hidden[None, :], enc_long), atol=1e-4, rtol=1e-4))
    ok &= bool(jnp.allclose(jnp.sum(out_long), 1.0, atol=1e-3))
    assert out_long.shape == (1, S_long)

    # ---- force the multi-tile online-softmax path (tiny tile budget -> 3 tiles) ----
    attn_dot_tiled = AttnPallas('dot', F1, F2, H, k_m1, compute_dtype=jnp.float32,
                                tile_target_bytes=128 * H * 4)
    out_tiled = jax.block_until_ready(attn_dot_tiled(hidden, enc_long))
    ok &= bool(jnp.allclose(out_tiled, ref_dot(hidden[None, :], enc_long), atol=1e-4, rtol=1e-4))
    ok &= bool(jnp.allclose(jnp.sum(out_tiled), 1.0, atol=1e-3))
    assert out_tiled.shape == (1, S_long)

    assert ok, "Pallas output does not match pure-JAX reference"
    print("KERNEL_OK")
</pallas_src>

<mosaic_0001>
module attributes {stable_mosaic.version = 11 : i64} {
  func.func @_scores_softmax_kernel(%arg0: i32, %arg1: memref<1x32xf32, #tpu.memory_space<vmem>>, %arg2: memref<32x128xf32, #tpu.memory_space<vmem>>, %arg3: memref<1x128xf32, #tpu.memory_space<vmem>>, %arg4: memref<1x1xf32, #tpu.memory_space<vmem>>, %arg5: memref<1x1xf32, #tpu.memory_space<vmem>>) attributes {dimension_semantics = [#tpu.dimension_semantics<arbitrary>], iteration_bounds = array<i64: 1>, scalar_prefetch = 0 : i64, scratch_operands = 2 : i64, tpu.core_type = #tpu.core_type<tc>, window_params = [{pipeline_mode = #tpu.pipeline_mode<synchronous>, transform_indices = @transform_0, window_bounds = array<i64: 1, 32>}, {transform_indices = @transform_1, window_bounds = array<i64: 32, 128>}, {pipeline_mode = #tpu.pipeline_mode<synchronous>, transform_indices = @transform_2, window_bounds = array<i64: 1, 128>}]} {
    %c128_i32 = arith.constant 128 : i32
    %0 = arith.muli %arg0, %c128_i32 : i32
    %1 = tpu.assume_multiple %0, 128 : i32
    %c0 = arith.constant 0 : index
    %c0_0 = arith.constant 0 : index
    %2 = vector.load %arg1[%c0, %c0_0] : memref<1x32xf32, #tpu.memory_space<vmem>>, vector<1x32xf32>
    %c0_1 = arith.constant 0 : index
    %c0_2 = arith.constant 0 : index
    %3 = vector.load %arg2[%c0_1, %c0_2] : memref<32x128xf32, #tpu.memory_space<vmem>>, vector<32x128xf32>
    %cst = arith.constant dense<0.000000e+00> : vector<1x128xf32>
    %4 = tpu.matmul %2, %3, %cst {dimension_numbers = #tpu.dot_dimension_numbers<[1], [0], [0], [1], [0, 0, 1, 1], [], []>} : vector<1x32xf32>, vector<32x128xf32>, vector<1x128xf32> -> vector<1x128xf32>
    %5 = tpu.iota {dimensions = array<i32: 1>} : vector<1x128xi32>
    %6 = vector.broadcast %1 : i32 to vector<1x128xi32>
    %7 = arith.addi %5, %6 : vector<1x128xi32>
    %c8_i32 = arith.constant 8 : i32
    %8 = vector.broadcast %c8_i32 : i32 to vector<1x128xi32>
    %9 = arith.cmpi slt, %7, %8 : vector<1x128xi32>
    %cst_3 = arith.constant 0xFF800000 : f32
    %10 = vector.broadcast %cst_3 : f32 to vector<1x128xf32>
    %11 = arith.select %9, %4, %10 : vector<1x128xi1>, vector<1x128xf32>
    %cst_4 = arith.constant dense<0xFF800000> : vector<1xf32>
    %12 = vector.multi_reduction <maximumf>, %11, %cst_4 [1] : vector<1x128xf32> to vector<1xf32>
    %13 = vector.shape_cast %12 : vector<1xf32> to vector<1x1xf32>
    %14 = vector.broadcast %13 : vector<1x1xf32> to vector<1x128xf32>
    %15 = arith.subf %11, %14 : vector<1x128xf32>
    %16 = math.exp %15 : vector<1x128xf32>
    %cst_5 = arith.constant dense<0.000000e+00> : vector<1xf32>
    %17 = vector.multi_reduction <add>, %16, %cst_5 [1] : vector<1x128xf32> to vector<1xf32>
    %18 = vector.shape_cast %17 : vector<1xf32> to vector<1x1xf32>
    %19 = tpu.reciprocal %18 {approx = true} : vector<1x1xf32> -> vector<1x1xf32>
    %20 = arith.mulf %18, %19 : vector<1x1xf32>
    %cst_6 = arith.constant 2.000000e+00 : f32
    %21 = vector.broadcast %cst_6 : f32 to vector<1x1xf32>
    %22 = arith.subf %21, %20 : vector<1x1xf32>
    %23 = arith.mulf %19, %22 : vector<1x1xf32>
    %24 = vector.broadcast %23 : vector<1x1xf32> to vector<1x128xf32>
    %25 = arith.mulf %16, %24 : vector<1x128xf32>
    %c0_7 = arith.constant 0 : index
    %c0_8 = arith.constant 0 : index
    %26 = vector.load %arg3[%c0_7, %c0_8] : memref<1x128xf32, #tpu.memory_space<vmem>>, vector<1x128xf32>
    tpu.vector_store %arg3[%c0_7, %c0_8], %25 {strides = array<i32>} : memref<1x128xf32, #tpu.memory_space<vmem>>, vector<1x128xf32>,
    return
  }
  func.func @transform_0(%arg0: i32) -> (i32, i32) {
    %c0_i32 = arith.constant 0 : i32
    %c0_i32_0 = arith.constant 0 : i32
    %c0_i32_1 = arith.constant 0 : i32
    return %c0_i32, %c0_i32_0 : i32, i32
  }
  func.func @transform_1(%arg0: i32) -> (i32, i32) {
    %c0_i32 = arith.constant 0 : i32
    %c0_i32_0 = arith.constant 0 : i32
    return %c0_i32, %arg0 : i32, i32
  }
  func.func @transform_2(%arg0: i32) -> (i32, i32) {
    %c0_i32 = arith.constant 0 : i32
    %c0_i32_0 = arith.constant 0 : i32
    %c0_i32_1 = arith.constant 0 : i32
    return %c0_i32, %c0_i32_0 : i32, i32
  }
}

</mosaic_0001>

<bundles_post_ra>
// kernel: _forward.1
= control target key start
LH: loop header
LB: loop body
LE: loop exit
PB: predicated region body
PF: predicated region fallthrough
CT: control target
= control target key end

     0   :  { %v174_v1 = vmov 0.0   ;;  %vm175_vm0 = vmmov 0   ;;  %s210_s0 = inlined_call_operand.vmem [shape: f32[1,32], index: 0, kind: input, shape index: {}]   ;;  %s211_s1 = inlined_call_operand.vmem [shape: f32[32,128], index: 1, kind: input, shape index: {}]   ;;  %s212_s2 = inlined_call_operand.hbm [shape: f32[1,128], index: 2, kind: output, shape index: {}]  }
   0x1   :  { %v17_v0 = vld [vmem:[%s211_s1 + $0x18] sm:$0xff]  ;;  %134 = vmatprep.subr.mxu0 %v174_v1  ;;  %v16_v2 = vld [vmem:[%s211_s1 + $0x10] sm:$0xff]  ;;  %142 = vmatprep.mubr.msk.f32.mxu0 %vm175_vm0, %v174_v1 }
   0x2   :  { %7 = vsyncpa [#allocation5], 0  ;;  %135 = vmatpush3.msra.mxu0 %v17_v0  ;;  %v15_v3 = vld [vmem:[%s211_s1 + $0x8] sm:$0xff]  ;;  %v14_v4 = vld [vmem:[%s211_s1] sm:$0xff]  ;;  %vm18_vm1 = vcmask 261120   ;;  %v92_v6 = vlaneseq  ;;  %vm98_vm3 = vcmask 1040384  }
   0x3   :  { %136 = vmatprep.subr.mxu0 %v174_v1  ;;  %v13_v5 = vld [vmem:[%s210_s0] sm:$0x1]  ;;  %s176_s0 = smov [#allocation4]  }
   0x4   :  { %137 = vmatpush3.msra.mxu0 %v16_v2  ;;  %v93_v7 = vand.u32 127, %v92_v6  ;;  %s120_s1 = sshll.u32 %s176_s0, 4  ;;  %s121_s1 = int_to_ptr.vmem [resolvable:$true] %s120_s1 }
   0x5   :  { %138 = vmatprep.subr.mxu0 %v174_v1  ;;  %s152_s19 = scalar_lea.vmem %s121_s1, 16  ;;  %s156_s20 = scalar_lea.vmem %s121_s1, 32 }
   0x6   :  { %139 = vmatpush3.msra.mxu0 %v15_v3  ;;  %vm96_vm2 = vcmp.lt.s32.totalorder %v93_v7, 8  ;;  %p153_p0 = scmp.ne.s32.totalorder %s121_s1, %s152_s19  ;;  %p157_p1 = scmp.lt.s32.totalorder %s121_s1, %s121_s1 }
   0x7   :  { %140 = vmatprep.subr.mxu0 %v174_v1  ;;  %p158_p2 = scmp.lt.s32.totalorder %s156_s20, %s152_s19 }
   0x8   :  { %141 = vmatpush3.msra.mxu0 %v14_v4 }
   0x9   :  { %143 = vmatmul.mubr.msk.f32.vlgmr.msra.gmra.mxu0 %vm18_vm1, %v13_v5  ;;  %p159_p3 = por %p158_p2, %p157_p1 }
   0xb   :  { %p160_p4 = pnand %p159_p3, %p153_p0 }
  0xc9   :  { %v88_v8 = vpop.f32.mrf.mxu0 }
  0xca   :  { %v97_v9 = vsel %vm96_vm2, %v88_v8, -inf }
  0xcb   :  { %v144_v10 = vpop.f32.mrf.mxu0  ;;  %v99_v11 = vsel %vm98_vm3, %v97_v9, -inf }
  0xcc   :  { %100 = vmax.xlane.f32.xlu0 %v99_v11 }
 0x155   :  { %v101_v12 = vpop.xlane.xlu0 %100 }
 0x156   :  { %v102_v13 = vsub.f32 %v97_v9, %v101_v12 }
 0x158   :  { %v103_v14 = vmul.f32 1.442695, %v102_v13 }
 0x15a   :  { %148 = vpow2.f32 %v103_v14 }
 0x167   :  { %v149_v15 = vpop.eup %148 }
 0x168   :  { %v105_v16 = vsel %vm98_vm3, %v149_v15, 0.0 }
 0x169   :  { %106 = vadd.xlane.f32.xlu0 %v105_v16 }
 0x1f2   :  { %v107_v17 = vpop.xlane.xlu0 %106 }
 0x1f3   :  { %150 = vrcp.f32 %v107_v17 }
 0x200   :  { %v151_v18 = vpop.eup %150 }
 0x201   :  { %v109_v19 = vmul.f32 %v151_v18, %v107_v17 }
 0x203   :  { %v110_v20 = vsub.f32 2.0, %v109_v19 }
 0x205   :  { %v111_v21 = vmul.f32 %v151_v18, %v110_v20 }
 0x207   :  { %v112_v22 = vmul.f32 %v149_v15, %v111_v21 }
 0x209   :  { %113 = vst [vmem:[#allocation4] sm:$0x1] %v112_v22 }
 0x20a   :  { %163 = shalt.err (!%p160_p4)
}
 0x20b   :  { %123 = dma.vmem_to_hbm [thread:$0]  %s121_s1, 16, %s212_s2, [#allocation5]  }
 0x20c   :  { %172 = dma.done.wait [#allocation5], 16  }
 0x20d   :  { %173 = vsyncadd [#allocation5], 4294967280 }
 0x20e   :  { %127 = vsyncpa [#allocation5], 1 }

</bundles_post_ra>
